<compile_context>
chip_gen: v7x
topology: tpu7x:2x2x1
jax: 0.10.0
libtpu: 0.0.40
codegen_flags: <defaults>
</compile_context>

<pallas_src>
import jax
import jax.numpy as jnp
from jax.experimental import pallas as pl
from jax.experimental.pallas import tpu as pltpu


def _round_up(x, m):
    return -(-x // m) * m


def _group_linear_kernel(x_ref, w_ref, b_ref, o_ref):
    # x_ref: (TM, Kf), w_ref: (Kf, Nf), b_ref: (1, Nf), o_ref: (TM, Nf)
    acc = jnp.dot(x_ref[...], w_ref[...], preferred_element_type=jnp.float32)
    acc = acc + b_ref[...].astype(jnp.float32)
    o_ref[...] = acc.astype(o_ref.dtype)


def pick_fold(M, out_dim, lane=128):
    """Largest row-fold factor f with f*out_dim <= 128 that divides M (so the
    (M, in) -> (M/f, f*in) reshape stays a pure view)."""
    if out_dim >= lane:
        return 1
    f = max(1, lane // out_dim)
    while f > 1 and M % f != 0:
        f -= 1
    return f


def fuse_group_linear_params(W, b, out_dim, groups, shuffle, fold=1):
    """Build the fused weight/bias ONCE (cache with the parameters, not per call).

    W: (groups, 1, group_inp, group_out), b: (groups, 1, 1, group_out)
    Returns W_f: (fold*in_dim, fold*out_dim), b_f: (1, fold*out_dim).
    """
    groups_w, _, group_inp, group_out = W.shape
    assert groups_w == groups and group_out * groups == out_dim
    in_dim = groups * group_inp
    dtype = W.dtype

    # Block-diagonal over groups: W_bd[g*gi + i, h*go + o] = W[g, i, o] * (g == h).
    Wg = W.reshape(groups, group_inp, group_out)
    eye_g = jnp.eye(groups, dtype=dtype)
    W_bd = jnp.einsum('gio,gh->giho', Wg, eye_g).reshape(in_dim, out_dim)
    b_flat = b.reshape(1, out_dim).astype(dtype)

    if shuffle:
        # shuffled column j = o*groups + g  <-  unshuffled column g*group_out + o
        j = jnp.arange(out_dim)
        perm = (j % groups) * group_out + (j // groups)
        W_bd = W_bd[:, perm]
        b_flat = b_flat[:, perm]

    if fold > 1:
        # Lane-fold `fold` consecutive rows into lanes:
        # W_f[r*in_dim + k, s*out_dim + o] = W_bd[k, o] * (r == s).
        eye_f = jnp.eye(fold, dtype=dtype)
        W_f = jnp.einsum('ko,rs->rkso', W_bd, eye_f).reshape(fold * in_dim, fold * out_dim)
        b_f = jnp.tile(b_flat, (1, fold))
    else:
        W_f, b_f = W_bd, b_flat
    return W_f, b_f


def group_linear_forward(x, W_fused, b_fused, out_dim, fold=1, tm=None):
    """x: (batch, seq, in_dim) -> (batch, seq, out_dim).

    W_fused / b_fused come from fuse_group_linear_params (precomputed once)."""
    batch, seq, in_dim = x.shape
    M = batch * seq
    f = int(fold)
    Kf, Nf = W_fused.shape
    assert Kf == f * in_dim and Nf == f * out_dim
    assert M % f == 0, "fold must divide batch*seq (use pick_fold)"
    Mf = M // f

    # Pure views: contiguous collapse of (batch, seq) + row folding into lanes.
    x2d = x.reshape(Mf, Kf)

    itemsize = jnp.dtype(x.dtype).itemsize
    if Mf <= 8:
        tm = Mf                                   # single whole-array block
    else:
        if tm is None:
            # ~4 MiB of x+out HBM traffic per grid step -> per-step overhead negligible.
            tm = (4 << 20) // ((Kf + Nf) * itemsize)
        tm = max(8, _round_up(int(tm), 8))
        # Keep >= 2 grid steps so the "parallel" axis can shard over v7x's 2 TCs.
        tm = min(tm, max(8, _round_up(pl.cdiv(Mf, 2), 8)))
        tm = min(tm, _round_up(Mf, 8))
    grid_m = pl.cdiv(Mf, tm)

    w_bytes = Kf * Nf * jnp.dtype(W_fused.dtype).itemsize
    b_bytes = Nf * jnp.dtype(b_fused.dtype).itemsize
    tile_bytes = tm * (Kf + Nf) * itemsize
    vmem_limit = int(min(max(w_bytes + b_bytes + 3 * tile_bytes + (2 << 20), 32 << 20),
                         64 << 20))

    cost = pl.CostEstimate(
        flops=2 * Mf * Kf * Nf,
        transcendentals=0,
        bytes_accessed=Mf * (Kf + Nf) * itemsize + w_bytes + b_bytes,
    )

    out2d = pl.pallas_call(
        _group_linear_kernel,
        out_shape=jax.ShapeDtypeStruct((Mf, Nf), x.dtype),
        grid_spec=pltpu.PrefetchScalarGridSpec(
            num_scalar_prefetch=0,
            grid=(grid_m,),
            in_specs=[
                pl.BlockSpec((tm, Kf), lambda i: (i, 0)),
                # Grid-invariant weight / bias: single-buffered to halve their VMEM use.
                pl.BlockSpec((Kf, Nf), lambda i: (0, 0), pipeline_mode=pl.Buffered(1)),
                pl.BlockSpec((1, Nf), lambda i: (0, 0), pipeline_mode=pl.Buffered(1)),
            ],
            out_specs=pl.BlockSpec((tm, Nf), lambda i: (i, 0)),
        ),
        compiler_params=pltpu.CompilerParams(
            dimension_semantics=("parallel",),
            vmem_limit_bytes=vmem_limit,
        ),
        cost_estimate=cost,
    )(x2d, W_fused, b_fused)

    # (Mf, f*out_dim) row-major == (M, out_dim) row-major: pure reshape, no data movement.
    return out2d.reshape(batch, seq, out_dim)


# ----------------------------------------------------------------------------- test scaffolding

def xavier_uniform(key, shape, dtype=jnp.float32):
    fan_in, fan_out = shape[-2], shape[-1]
    bound = (6.0 / (fan_in + fan_out)) ** 0.5
    return jax.random.uniform(key, shape, dtype, minval=-bound, maxval=bound)


def _reference(x, W, b, out_dim, groups, shuffle):
    batch, seq, in_dim = x.shape
    group_inp = in_dim // groups
    xg = x.reshape(batch, seq, groups, group_inp)
    xg = jnp.transpose(xg, (2, 0, 1, 3))                 # (G, B, S, gi)
    ref = jnp.matmul(xg, W) + b                          # (G, B, S, go)
    if shuffle:
        ref = jnp.transpose(ref, (1, 2, 3, 0))           # (B, S, go, G)
    else:
        ref = jnp.transpose(ref, (1, 2, 0, 3))           # (B, S, G, go)
    return ref.reshape(batch, seq, out_dim)


if __name__ == "__main__":
    dim1, dim2 = 16, 16          # in_dim = 32
    in_dim = dim1 + dim2
    out_dim = 32
    groups = 4
    group_inp = in_dim // groups   # 8
    group_out = out_dim // groups  # 8

    key = jax.random.PRNGKey(0)
    kw, kb, kx1, kx2, kx3 = jax.random.split(key, 5)

    W = xavier_uniform(kw, (groups, 1, group_inp, group_out))
    # PyTorch inits b to zeros; use small random values so the bias path is exercised.
    b = 0.1 * jax.random.normal(kb, (groups, 1, 1, group_out), dtype=jnp.float32)

    ok = True

    # Case 1: module-spec shapes (batch=2, seq=8), shuffle on/off.  Fused params are
    # built once per configuration (hoisted out of the forward path).
    batch, seq = 2, 8
    x = jax.random.normal(kx1, (batch, seq, in_dim), dtype=jnp.float32)
    fold = pick_fold(batch * seq, out_dim)               # 4 -> 128-lane-dense output
    for shuffle in (True, False):
        W_f, b_f = fuse_group_linear_params(W, b, out_dim, groups, shuffle, fold=fold)
        out = jax.block_until_ready(group_linear_forward(x, W_f, b_f, out_dim, fold=fold))
        ref = _reference(x, W, b, out_dim, groups, shuffle)
        ok &= out.shape == (batch, seq, out_dim)
        ok &= bool(jnp.allclose(out, ref, atol=1e-5, rtol=1e-5))

    # Case 2: multi-step grid (M=256 -> Mf=64, >= 2 grid steps on the parallel axis).
    batch2, seq2 = 2, 128
    x2 = jax.random.normal(kx2, (batch2, seq2, in_dim), dtype=jnp.float32)
    fold2 = pick_fold(batch2 * seq2, out_dim)
    W_f2, b_f2 = fuse_group_linear_params(W, b, out_dim, groups, True, fold=fold2)
    out2 = jax.block_until_ready(group_linear_forward(x2, W_f2, b_f2, out_dim, fold=fold2))
    ref2 = _reference(x2, W, b, out_dim, groups, True)
    ok &= bool(jnp.allclose(out2, ref2, atol=1e-5, rtol=1e-5))

    # Case 3: ragged M (M=60 -> Mf=15): partial last block, no wrapper pad/slice copies.
    batch3, seq3 = 2, 30
    x3 = jax.random.normal(kx3, (batch3, seq3, in_dim), dtype=jnp.float32)
    fold3 = pick_fold(batch3 * seq3, out_dim)
    W_f3, b_f3 = fuse_group_linear_params(W, b, out_dim, groups, False, fold=fold3)
    out3 = jax.block_until_ready(
        group_linear_forward(x3, W_f3, b_f3, out_dim, fold=fold3, tm=8))
    ref3 = _reference(x3, W, b, out_dim, groups, False)
    ok &= bool(jnp.allclose(out3, ref3, atol=1e-5, rtol=1e-5))

    assert ok
    print("KERNEL_OK")
</pallas_src>

<mosaic_0001>
module attributes {stable_mosaic.version = 11 : i64} {
  func.func @_group_linear_kernel(%arg0: i32, %arg1: memref<4x128xf32, #tpu.memory_space<vmem>>, %arg2: memref<128x128xf32, #tpu.memory_space<vmem>>, %arg3: memref<1x128xf32, #tpu.memory_space<vmem>>, %arg4: memref<4x128xf32, #tpu.memory_space<vmem>>) attributes {dimension_semantics = [#tpu.dimension_semantics<parallel>], iteration_bounds = array<i64: 1>, scalar_prefetch = 0 : i64, scratch_operands = 0 : i64, tpu.core_type = #tpu.core_type<tc>, window_params = [{transform_indices = @transform_0, window_bounds = array<i64: 4, 128>}, {pipeline_mode = #tpu.pipeline_mode<synchronous>, transform_indices = @transform_1, window_bounds = array<i64: 128, 128>}, {pipeline_mode = #tpu.pipeline_mode<synchronous>, transform_indices = @transform_2, window_bounds = array<i64: 1, 128>}, {transform_indices = @transform_3, window_bounds = array<i64: 4, 128>}]} {
    %c0 = arith.constant 0 : index
    %c0_0 = arith.constant 0 : index
    %0 = vector.load %arg1[%c0, %c0_0] : memref<4x128xf32, #tpu.memory_space<vmem>>, vector<4x128xf32>
    %c0_1 = arith.constant 0 : index
    %c0_2 = arith.constant 0 : index
    %1 = vector.load %arg2[%c0_1, %c0_2] : memref<128x128xf32, #tpu.memory_space<vmem>>, vector<128x128xf32>
    %cst = arith.constant dense<0.000000e+00> : vector<4x128xf32>
    %2 = tpu.matmul %0, %1, %cst {dimension_numbers = #tpu.dot_dimension_numbers<[1], [0], [0], [1], [0, 0, 1, 1], [], []>} : vector<4x128xf32>, vector<128x128xf32>, vector<4x128xf32> -> vector<4x128xf32>
    %c0_3 = arith.constant 0 : index
    %c0_4 = arith.constant 0 : index
    %3 = vector.load %arg3[%c0_3, %c0_4] : memref<1x128xf32, #tpu.memory_space<vmem>>, vector<1x128xf32>
    %4 = vector.broadcast %3 : vector<1x128xf32> to vector<4x128xf32>
    %5 = arith.addf %2, %4 : vector<4x128xf32>
    %c0_5 = arith.constant 0 : index
    %c0_6 = arith.constant 0 : index
    %6 = vector.load %arg4[%c0_5, %c0_6] : memref<4x128xf32, #tpu.memory_space<vmem>>, vector<4x128xf32>
    tpu.vector_store %arg4[%c0_5, %c0_6], %5 {strides = array<i32>} : memref<4x128xf32, #tpu.memory_space<vmem>>, vector<4x128xf32>,
    return
  }
  func.func @transform_0(%arg0: i32) -> (i32, i32) {
    %c0_i32 = arith.constant 0 : i32
    %c0_i32_0 = arith.constant 0 : i32
    return %arg0, %c0_i32 : i32, i32
  }
  func.func @transform_1(%arg0: i32) -> (i32, i32) {
    %c0_i32 = arith.constant 0 : i32
    %c0_i32_0 = arith.constant 0 : i32
    %c0_i32_1 = arith.constant 0 : i32
    return %c0_i32, %c0_i32_0 : i32, i32
  }
  func.func @transform_2(%arg0: i32) -> (i32, i32) {
    %c0_i32 = arith.constant 0 : i32
    %c0_i32_0 = arith.constant 0 : i32
    %c0_i32_1 = arith.constant 0 : i32
    return %c0_i32, %c0_i32_0 : i32, i32
  }
  func.func @transform_3(%arg0: i32) -> (i32, i32) {
    %c0_i32 = arith.constant 0 : i32
    %c0_i32_0 = arith.constant 0 : i32
    return %arg0, %c0_i32 : i32, i32
  }
}

</mosaic_0001>

<bundles_post_ra>
// kernel: tpu_custom_call.1
= control target key start
LH: loop header
LB: loop body
LE: loop exit
PB: predicated region body
PF: predicated region fallthrough
CT: control target
= control target key end

     0   :  { %8 = vsyncpa [#allocation3], 0  ;;  %s383_s0 = inlined_call_operand.hbm [shape: f32[4,128], index: 0, kind: input, shape index: {}]   ;;  %s384_s1 = inlined_call_operand.hbm [shape: f32[128,128], index: 1, kind: input, shape index: {}]   ;;  %s385_s2 = inlined_call_operand.vmem [shape: f32[1,128], index: 2, kind: input, shape index: {}]   ;;  %s386_s3 = inlined_call_operand.hbm [shape: f32[4,128], index: 3, kind: output, shape index: {}]  }
   0x1   :  { %9 = vsyncpa [#allocation6], 0 }
   0x2   :  { %10 = vsyncpa [#allocation4], 0  ;;  %s309_s12 = smov [#allocation2]   ;;  %s310_s14 = smov [#allocation5]  }
   0x3   :  { %s17_s13 = sshll.u32 %s309_s12, 4  ;;  %s26_s15 = sshll.u32 %s310_s14, 4  ;;  %s18_s13 = int_to_ptr.vmem [resolvable:$true] %s17_s13  ;;  %s337_s15 = int_to_ptr.vmem [resolvable:$true] %s26_s15 }
   0x4   :  { %s237_s18 = scalar_lea.hbm %s383_s0, 64 }
   0x5   :  { %p238_p0 = scmp.ne.s32.totalorder %s383_s0, %s237_s18  ;;  %p241_p1 = scmp.lt.u32.totalorder %s237_s18, %s383_s0 }
   0x7   :  { %p243_p2 = pnand %p241_p1, %p238_p0 }
   0x9   :  { %246 = shalt.err (!%p243_p2)
}
   0xa   :  { %s247_s23 = scalar_lea.vmem %s18_s13, 64  ;;  %p252_p4 = scmp.lt.s32.totalorder %s18_s13, %s18_s13 }
   0xb   :  { %p248_p3 = scmp.ne.s32.totalorder %s18_s13, %s247_s23  ;;  %p253_p5 = scmp.lt.s32.totalorder %s247_s23, %s247_s23 }
   0xd   :  { %p254_p6 = por %p253_p5, %p252_p4 }
   0xf   :  { %p255_p7 = pnand %p254_p6, %p248_p3 }
  0x11   :  { %258 = shalt.err (!%p255_p7)
}
  0x12   :  { %20 = dma.hbm_to_vmem [thread:$0]  %s383_s0, 64, %s18_s13, [#allocation3]  }
  0x13   :  { %s259_s28 = scalar_lea.hbm %s384_s1, 2048 }
  0x14   :  { %p260_p8 = scmp.ne.s32.totalorder %s384_s1, %s259_s28  ;;  %p263_p9 = scmp.lt.u32.totalorder %s259_s28, %s384_s1 }
  0x16   :  { %p265_p10 = pnand %p263_p9, %p260_p8 }
  0x18   :  { %268 = shalt.err (!%p265_p10)
}
  0x19   :  { %s269_s6 = scalar_lea.vmem %s337_s15, 2048  ;;  %p274_p12 = scmp.lt.s32.totalorder %s337_s15, %s337_s15 }
  0x1a   :  { %p270_p11 = scmp.ne.s32.totalorder %s337_s15, %s269_s6  ;;  %p275_p13 = scmp.lt.s32.totalorder %s269_s6, %s269_s6 }
  0x1c   :  { %p276_p0 = por %p275_p13, %p274_p12 }
  0x1e   :  { %p277_p1 = pnand %p276_p0, %p270_p11 }
  0x20   :  { %280 = shalt.err (!%p277_p1)
}
  0x21   :  { %s311_s0 = smov 128   ;;  %s312_s7 = smov 8  }
  0x22   :  { %32 = dma.hbm_to_vmem [thread:$0]  %s384_s1, 2048, %s337_s15, [#allocation6], %s311_s0, %s311_s0, %s312_s7  }
  0x23   :  { %303 = dma.done.wait [#allocation3], 64  }
  0x24   :  { %304 = vsyncadd [#allocation3], 4294967232 }
  0x25   :  { %305 = dma.done.wait [#allocation6], 2048  }
  0x26   :  { %306 = vsyncadd [#allocation6], 4294965248  ;;  %v313_v0 = vmov 0.0|0.0   ;;  %vm314_vm0 = vmmov 0   ;;  %v315_v1 = vmov 0.0   ;;  %v42_v2 = vld [vmem:[#allocation5] sm:$0xff] }
  0x27   :  { %205 = vmatprep.subr.bf16.mxu0 %v313_v0  ;;  %202 = vmatprep.mubr.msk.f32.mxu0 %vm314_vm0, %v315_v1  ;;  %v43_v3 = vld [vmem:[#allocation5 + $0x8] sm:$0xff]  ;;  %v44_v4 = vld [vmem:[#allocation5 + $0x10] sm:$0xff]  ;;  %v45_v6 = vld [vmem:[#allocation5 + $0x18] sm:$0xff]  ;;  %s316_s11 = smov [#allocation7]  }
  0x28   :  { %v206_v5 = vpack.c.bf16 %v43_v3, %v42_v2  ;;  %v209_v7 = vpack.c.bf16 %v45_v6, %v44_v4  ;;  %v46_v8 = vld [vmem:[#allocation5 + $0x20] sm:$0xff]  ;;  %v47_v9 = vld [vmem:[#allocation5 + $0x28] sm:$0xff]  ;;  %v48_v11 = vld [vmem:[#allocation5 + $0x30] sm:$0xff]  ;;  %s142_s12 = sshll.u32 %s316_s11, 4  ;;  %s143_s12 = int_to_ptr.vmem [resolvable:$true] %s142_s12 }
  0x29   :  { %v212_v10 = vpack.c.bf16 %v47_v9, %v46_v8  ;;  %v49_v12 = vld [vmem:[#allocation5 + $0x38] sm:$0xff]  ;;  %v50_v14 = vld [vmem:[#allocation5 + $0x40] sm:$0xff]  ;;  %v51_v15 = vld [vmem:[#allocation5 + $0x48] sm:$0xff]  ;;  %s281_s13 = scalar_lea.vmem %s143_s12, 64  ;;  %p286_p3 = scmp.lt.s32.totalorder %s143_s12, %s143_s12 }
  0x2a   :  { %207 = vmatpush3.bf16.msra.mxu0 %v206_v5  ;;  %v215_v13 = vpack.c.bf16 %v49_v12, %v48_v11  ;;  %v218_v16 = vpack.c.bf16 %v51_v15, %v50_v14  ;;  %v52_v17 = vld [vmem:[#allocation5 + $0x50] sm:$0xff]  ;;  %v53_v18 = vld [vmem:[#allocation5 + $0x58] sm:$0xff]  ;;  %v54_v20 = vld [vmem:[#allocation5 + $0x60] sm:$0xff]  ;;  %p282_p2 = scmp.ne.s32.totalorder %s143_s12, %s281_s13  ;;  %p287_p4 = scmp.lt.s32.totalorder %s281_s13, %s281_s13 }
  0x2b   :  { %208 = vmatprep.subr.bf16.mxu0 %v313_v0  ;;  %v221_v19 = vpack.c.bf16 %v53_v18, %v52_v17  ;;  %v55_v21 = vld [vmem:[#allocation5 + $0x68] sm:$0xff]  ;;  %v56_v23 = vld [vmem:[#allocation5 + $0x70] sm:$0xff]  ;;  %v57_v24 = vld [vmem:[#allocation5 + $0x78] sm:$0xff] }
  0x2c   :  { %v224_v22 = vpack.c.bf16 %v55_v21, %v54_v20  ;;  %v227_v25 = vpack.c.bf16 %v57_v24, %v56_v23  ;;  %v41_v26 = vld [vmem:[#allocation2] sm:$0xf]  ;;  %p288_p5 = por %p287_p4, %p286_p3 }
  0x2d   :  { %v152_v27 = vld [vmem:[%s385_s2] ss:$0 sm:$0xff] }
  0x2e   :  { %210 = vmatpush3.bf16.msra.mxu0 %v209_v7  ;;  %p289_p6 = pnand %p288_p5, %p282_p2 }
  0x2f   :  { %211 = vmatprep.subr.bf16.mxu0 %v313_v0 }
  0x32   :  { %213 = vmatpush3.bf16.msra.mxu0 %v212_v10 }
  0x33   :  { %214 = vmatprep.subr.bf16.mxu0 %v313_v0 }
  0x36   :  { %216 = vmatpush3.bf16.msra.mxu0 %v215_v13 }
  0x37   :  { %217 = vmatprep.subr.bf16.mxu0 %v313_v0 }
  0x3a   :  { %219 = vmatpush3.bf16.msra.mxu0 %v218_v16 }
  0x3b   :  { %220 = vmatprep.subr.bf16.mxu0 %v313_v0 }
  0x3e   :  { %222 = vmatpush3.bf16.msra.mxu0 %v221_v19 }
  0x3f   :  { %223 = vmatprep.subr.bf16.mxu0 %v313_v0 }
  0x42   :  { %225 = vmatpush3.bf16.msra.mxu0 %v224_v22 }
  0x43   :  { %226 = vmatprep.subr.bf16.mxu0 %v313_v0 }
  0x46   :  { %228 = vmatpush3.bf16.msra.mxu0 %v227_v25 }
  0x49   :  { %203 = vmatmul.mubr.f32.vlgmr.msra.gmra.mrb[0].mxu0 %v41_v26 }
 0x11c   :  { %v131_v28 = vpop.f32.mrb[0].mxu0 }
 0x11d   :  { %v132_v29 = vadd.f32 %v152_v27, %v131_v28  ;;  %v204_v30 = vpop.f32.mrb[1].mxu0 }
 0x11f   :  { %135 = vst [vmem:[#allocation7] sm:$0xf] %v132_v29 }
 0x120   :  { %292 = shalt.err (!%p289_p6)
}
 0x121   :  { %s293_s16 = scalar_lea.hbm %s386_s3, 64 }
 0x122   :  { %p294_p7 = scmp.ne.s32.totalorder %s386_s3, %s293_s16  ;;  %p297_p8 = scmp.lt.u32.totalorder %s293_s16, %s386_s3 }
 0x124   :  { %p299_p9 = pnand %p297_p8, %p294_p7 }
 0x126   :  { %302 = shalt.err (!%p299_p9)
}
 0x127   :  { %145 = dma.vmem_to_hbm [thread:$0]  %s143_s12, 64, %s386_s3, [#allocation4]  }
 0x128   :  { %307 = dma.done.wait [#allocation4], 64  }
 0x129   :  { %308 = vsyncadd [#allocation4], 4294967232 }
 0x12a   :  { %149 = vsyncpa [#allocation3], 1 }
 0x12b   :  { %150 = vsyncpa [#allocation6], 1 }
 0x12c   :  { %151 = vsyncpa [#allocation4], 1 }

</bundles_post_ra>
